<compile_context>
chip_gen: v5e
topology: v5e:2x2
jax: 0.10.0
libtpu: 0.0.40
codegen_flags: <defaults>
</compile_context>

<pallas_src>
import jax
import jax.numpy as jnp
from jax.experimental import pallas as pl
from jax.experimental.pallas import tpu as pltpu

_LANES = 128            # vreg lane width
_MAX_TILE_ROWS = 8192   # 8192 x 128 x 4B = 4 MiB per block


def _linreg_kernel(w_ref, x_ref, o_ref):
    # out = x * w  (Linear(1, 1, bias=False) applied elementwise over the
    # lane-dense view). w_ref is a (1,1) f32 in SMEM -> scalar broadcast on VPU.
    o_ref[...] = x_ref[...] * w_ref[0, 0]


def linear_regression_forward(x, weight):
    """x: (N, 1) f32, weight: (1, 1) f32 (out_features, in_features). Returns (N, 1) f32."""
    N, F = x.shape
    assert F == 1 and weight.shape == (1, 1)
    # Sublane rounding below assumes f32 (8-row tiles); bf16 would need 16.
    assert x.dtype == jnp.float32 and weight.dtype == jnp.float32

    rows = max(pl.cdiv(N, _LANES), 1)
    total = rows * _LANES

    # Lane-dense view. Fast path: N % 128 == 0 -> free reshape, no pad/slice.
    flat = x.reshape(-1)
    if total != N:
        flat = jnp.pad(flat, (0, total - N))  # <=127 padded elements
    x2d = flat.reshape(rows, _LANES)

    # Tile selection: multiple of 8 sublanes (or full extent), >=2 grid steps
    # whenever rows > 8 so both v7x TensorCores get work.
    if rows <= 8:
        tile_rows = rows                         # block == full array dims
    else:
        half = (((rows + 1) // 2) + 7) // 8 * 8  # ~half the rows, mult of 8
        tile_rows = min(_MAX_TILE_ROWS, half)
    grid = (pl.cdiv(rows, tile_rows),)           # partial last block is OK

    out2d = pl.pallas_call(
        _linreg_kernel,
        out_shape=jax.ShapeDtypeStruct((rows, _LANES), x.dtype),
        grid=grid,
        in_specs=[
            # Scalar weight stays on the scalar path (SMEM), read as w_ref[0,0].
            pl.BlockSpec(memory_space=pltpu.MemorySpace.SMEM),
            # Lane-dense, tiled, auto double-buffered input blocks.
            pl.BlockSpec((tile_rows, _LANES), lambda i: (i, 0)),
        ],
        out_specs=pl.BlockSpec((tile_rows, _LANES), lambda i: (i, 0)),
        compiler_params=pltpu.CompilerParams(
            dimension_semantics=("parallel",),
            vmem_limit_bytes=24 << 20,
        ),
        cost_estimate=pl.CostEstimate(
            flops=total, transcendentals=0, bytes_accessed=2 * total * 4),
    )(weight, x2d)

    # Undo the lane-dense view (free when N % 128 == 0).
    out_flat = out2d.reshape(-1)
    if total != N:
        out_flat = out_flat[:N]
    return out_flat.reshape(N, 1)


if __name__ == "__main__":
    key = jax.random.PRNGKey(0)
    k_w, k_x, k_x2 = jax.random.split(key, 3)

    # Deterministic parameter init mimicking PyTorch's Linear default
    # (uniform in [-1/sqrt(in_features), 1/sqrt(in_features)] = [-1, 1]).
    weight = jax.random.uniform(k_w, (1, 1), jnp.float32, minval=-1.0, maxval=1.0)

    # Small example input consistent with Linear(1, 1): batch=8, in_features=1.
    x = jax.random.normal(k_x, (8, 1), jnp.float32)
    out = jax.block_until_ready(linear_regression_forward(x, weight))
    ref = x @ weight.T
    assert out.shape == (8, 1) and out.dtype == jnp.float32
    assert jnp.allclose(out, ref, atol=1e-6), "mismatch vs reference (N=8)"

    # Secondary check exercising the padded tail + multi-block (grid=2) path.
    x2 = jax.random.normal(k_x2, (1200, 1), jnp.float32)
    out2 = jax.block_until_ready(linear_regression_forward(x2, weight))
    ref2 = x2 @ weight.T
    assert out2.shape == (1200, 1) and jnp.allclose(out2, ref2, atol=1e-6), \
        "mismatch vs reference (N=1200)"

    print("KERNEL_OK")
</pallas_src>

<mosaic_0001>
module attributes {stable_mosaic.version = 11 : i64} {
  func.func @_linreg_kernel(%arg0: i32, %arg1: memref<1x1xf32, #tpu.memory_space<smem>>, %arg2: memref<1x128xf32, #tpu.memory_space<vmem>>, %arg3: memref<1x128xf32, #tpu.memory_space<vmem>>) attributes {dimension_semantics = [#tpu.dimension_semantics<parallel>], iteration_bounds = array<i64: 1>, scalar_prefetch = 0 : i64, scratch_operands = 0 : i64, tpu.core_type = #tpu.core_type<tc>, window_params = [{transform_indices = @transform_0, window_bounds = array<i64: 1, 1>}, {transform_indices = @transform_1, window_bounds = array<i64: 1, 128>}, {transform_indices = @transform_2, window_bounds = array<i64: 1, 128>}]} {
    %c0 = arith.constant 0 : index
    %c0_0 = arith.constant 0 : index
    %0 = vector.load %arg2[%c0, %c0_0] : memref<1x128xf32, #tpu.memory_space<vmem>>, vector<1x128xf32>
    %c0_1 = arith.constant 0 : index
    %c0_2 = arith.constant 0 : index
    %1 = memref.load %arg1[%c0_1, %c0_2] : memref<1x1xf32, #tpu.memory_space<smem>>
    %2 = vector.broadcast %1 : f32 to vector<1x128xf32>
    %3 = arith.mulf %0, %2 : vector<1x128xf32>
    %c0_3 = arith.constant 0 : index
    %c0_4 = arith.constant 0 : index
    %4 = vector.load %arg3[%c0_3, %c0_4] : memref<1x128xf32, #tpu.memory_space<vmem>>, vector<1x128xf32>
    tpu.vector_store %arg3[%c0_3, %c0_4], %3 {strides = array<i32>} : memref<1x128xf32, #tpu.memory_space<vmem>>, vector<1x128xf32>,
    return
  }
  func.func @transform_0(%arg0: i32) -> (i32, i32) {
    %c0_i32 = arith.constant 0 : i32
    %c0_i32_0 = arith.constant 0 : i32
    %c0_i32_1 = arith.constant 0 : i32
    return %c0_i32, %c0_i32_0 : i32, i32
  }
  func.func @transform_1(%arg0: i32) -> (i32, i32) {
    %c0_i32 = arith.constant 0 : i32
    %c0_i32_0 = arith.constant 0 : i32
    return %arg0, %c0_i32 : i32, i32
  }
  func.func @transform_2(%arg0: i32) -> (i32, i32) {
    %c0_i32 = arith.constant 0 : i32
    %c0_i32_0 = arith.constant 0 : i32
    return %arg0, %c0_i32 : i32, i32
  }
}

</mosaic_0001>

<bundles_post_ra>
// kernel: tpu_custom_call.1
= control target key start
LH: loop header
LB: loop body
LE: loop exit
PB: predicated region body
PF: predicated region fallthrough
CT: control target
= control target key end

     0   :  { %s86_s0 = inlined_call_operand.<no memory space> [shape: f32[1,1], index: 0, kind: input, shape index: {}]   ;;  %s87_s1 = inlined_call_operand.vmem [shape: f32[1,128], index: 1, kind: input, shape index: {}]   ;;  %s88_s2 = inlined_call_operand.hbm [shape: f32[1,128], index: 2, kind: output, shape index: {}]  }
   0x1   :  { %v13_v0 = vld [vmem:[%s87_s1] sm:$0x1]  ;;  %v15_v1 = vstv %s86_s0 }
   0x2   :  { %8 = vsyncpa [#allocation4], 0  ;;  %s25_s15 = sshll.u32 %s88_s2, 4  ;;  %v16_v2 = vmul.f32 %v15_v1, %v13_v0  ;;  %s61_s16 = smov [#allocation3]   ;;  %s26_s15 = int_to_ptr.hbm [resolvable:$true] %s25_s15 }
   0x3   :  { %s23_s17 = sshll.u32 %s61_s16, 4  ;;  %s24_s17 = int_to_ptr.vmem [resolvable:$true] %s23_s17 }
   0x4   :  { %17 = vst [vmem:[#allocation3] sm:$0x1] %v16_v2 }
   0x5   :  { %28 = dma.vmem_to_hbm [thread:$0]  %s24_s17, 16, %s26_s15, [#allocation4]  }
   0x6   :  { %59 = dma.done.wait [#allocation4], 16  }
   0x7   :  { %60 = vsyncadd [#allocation4], 4294967280 }
   0x8   :  { %33 = vsyncpa [#allocation4], 1 }

</bundles_post_ra>
